<compile_context>
chip_gen: v6e
topology: v6e:2x2x1
jax: 0.10.0
libtpu: 0.0.40
codegen_flags: <defaults>
</compile_context>

<pallas_src>
import jax
import jax.numpy as jnp
from jax.experimental import pallas as pl
from jax.experimental.pallas import tpu as pltpu


# ---------------------------------------------------------------------------
# Fused kernel: linear (recomputed per step, stateless) + per-tile edge scores
# ---------------------------------------------------------------------------
def _logreg_fused_kernel(seq_ref, w_ref, b_ref, edges_ref, out_ref):
    # seq:   [N, F]        (VMEM resident, constant index_map)
    # w:     [C, F]        (PyTorch layout, no host transpose)
    # b:     [C, 1]
    # edges: [2, E_TILE]   int32, lane-dense (row 0 = src, row 1 = dst)
    # out:   [1, E_TILE]   lane-dense scores

    # Phase 1: retT = w @ seq^T + b  -> [C, N].  Recomputed every step (cheap at
    # C = 8) so there is no cross-step state and the grid axis can be "parallel"
    # (megacore sharding on v7x).
    rett = jax.lax.dot_general(
        w_ref[...], seq_ref[...],
        dimension_numbers=(((1,), (1,)), ((), ())),   # contract on F
        preferred_element_type=jnp.float32,
    ) + b_ref[...]                                     # bias bcast over N

    n = rett.shape[1]
    e_tile = edges_ref.shape[1]

    # Phase 2: vectorized one-hot gather through the MXU, single fused matmul.
    src = edges_ref[0:1, :]                            # [1, E_TILE] int32
    dst = edges_ref[1:2, :]                            # [1, E_TILE] int32
    idx_cat = jnp.concatenate([src, dst], axis=1)      # [1, 2*E_TILE]

    node_iota = jax.lax.broadcasted_iota(jnp.int32, (n, 1), 0)    # [N, 1]
    onehot = (node_iota == idx_cat).astype(jnp.float32)           # [N, 2*E_TILE]

    # [C, N] @ [N, 2*E_TILE] -> [C, 2*E_TILE]: exact row selection for src & dst.
    g = jnp.dot(rett, onehot, preferred_element_type=jnp.float32)
    g_src = g[:, :e_tile]
    g_dst = g[:, e_tile:]

    # Dense VPU multiply + sublane reduce over C (=8) -> lane-dense [1, E_TILE].
    out_ref[...] = jnp.sum(g_src * g_dst, axis=0, keepdims=True)


# ---------------------------------------------------------------------------
# Wrapper
# ---------------------------------------------------------------------------
def _vmem_limit_bytes():
    # Generation-aware VMEM limit: ~3/4 of physical capacity (v5e/v6e: 96 MiB,
    # v7x: 48 MiB).  Falls back to a safe 32 MiB if the query is unavailable.
    try:
        cap = int(pltpu.get_tpu_info().vmem_capacity_bytes)
        return max(32 * 1024 * 1024, (cap * 3) // 4)
    except Exception:
        return 32 * 1024 * 1024


def logreg_forward(w, b, seq, edges, edges_neg, *, e_tile=512):
    """w: [C, F] f32, b: [C, 1] f32, seq: [N, F] f32, edges/edges_neg: [E, 2] int."""
    n, f = seq.shape
    c = w.shape[0]
    e_all = edges.shape[0] + edges_neg.shape[0]

    # cat(pos, neg) then lay indices out lane-dense as [2, E].
    edges_all = jnp.concatenate([edges, edges_neg], axis=0).astype(jnp.int32).T

    # Wide (512-lane) edge tiles at large E amortize per-step overhead and fill
    # the 256-wide MXU; shrink to the smallest 128-multiple covering E when E is
    # small so we don't burn compute on padded lanes.
    e_tile = max(128, min(e_tile, ((max(e_all, 1) + 127) // 128) * 128))
    n_tiles = max(1, pl.cdiv(e_all, e_tile))
    e_pad = n_tiles * e_tile
    if e_pad != e_all:
        # Pad with an out-of-range index (== n): one-hot has no match, score 0.
        edges_all = jnp.pad(edges_all, ((0, 0), (0, e_pad - e_all)),
                            constant_values=n)

    out = pl.pallas_call(
        _logreg_fused_kernel,
        out_shape=jax.ShapeDtypeStruct((1, e_pad), jnp.float32),
        grid_spec=pltpu.PrefetchScalarGridSpec(
            num_scalar_prefetch=0,
            grid=(n_tiles,),
            in_specs=[
                pl.BlockSpec((n, f), lambda i: (0, 0)),        # seq (resident)
                pl.BlockSpec((c, f), lambda i: (0, 0)),        # w   (resident)
                pl.BlockSpec((c, 1), lambda i: (0, 0)),        # b   (resident)
                pl.BlockSpec((2, e_tile), lambda i: (0, i)),   # edge-index tile
            ],
            out_specs=pl.BlockSpec((1, e_tile), lambda i: (0, i)),
        ),
        compiler_params=pltpu.CompilerParams(
            # Edge tiles are fully independent (retT recomputed per step), so
            # the axis can shard across TensorCores (2x on v7x, no-op on v5e/v6e).
            dimension_semantics=("parallel",),
            vmem_limit_bytes=_vmem_limit_bytes(),
        ),
    )(seq, w, b, edges_all)

    return out[0, :e_all]


# ---------------------------------------------------------------------------
# Parameters (xavier_uniform_ weight, zero bias — matches the PyTorch init)
# ---------------------------------------------------------------------------
def init_logreg_params(key, ft_in, nb_classes):
    bound = jnp.sqrt(6.0 / (ft_in + nb_classes))
    w = jax.random.uniform(key, (nb_classes, ft_in), jnp.float32, -bound, bound)
    b = jnp.zeros((nb_classes, 1), jnp.float32)   # stored [C, 1]: no per-call reshape
    return w, b


if __name__ == "__main__":
    key = jax.random.PRNGKey(0)
    k_w, k_seq, k_e, k_en = jax.random.split(key, 4)

    N, FT_IN, NB_CLASSES = 16, 32, 8
    E_POS, E_NEG = 8, 8

    w, b = init_logreg_params(k_w, FT_IN, NB_CLASSES)
    seq = jax.random.normal(k_seq, (N, FT_IN), jnp.float32)
    edges = jax.random.randint(k_e, (E_POS, 2), 0, N, jnp.int32)
    edges_neg = jax.random.randint(k_en, (E_NEG, 2), 0, N, jnp.int32)

    out = jax.jit(logreg_forward)(w, b, seq, edges, edges_neg)
    jax.block_until_ready(out)

    # Pure-JAX reference check
    ret_ref = seq @ w.T + b[:, 0]
    ref = jnp.concatenate([
        (ret_ref[edges[:, 0]] * ret_ref[edges[:, 1]]).sum(-1),
        (ret_ref[edges_neg[:, 0]] * ret_ref[edges_neg[:, 1]]).sum(-1),
    ])
    assert out.shape == (E_POS + E_NEG,)
    assert jnp.allclose(out, ref, atol=1e-5, rtol=1e-5)

    print("KERNEL_OK")
</pallas_src>

<mosaic_0001>
module attributes {stable_mosaic.version = 11 : i64} {
  func.func @_logreg_fused_kernel(%arg0: i32, %arg1: memref<16x32xf32, #tpu.memory_space<vmem>>, %arg2: memref<8x32xf32, #tpu.memory_space<vmem>>, %arg3: memref<8x1xf32, #tpu.memory_space<vmem>>, %arg4: memref<2x128xi32, #tpu.memory_space<vmem>>, %arg5: memref<1x128xf32, #tpu.memory_space<vmem>>) attributes {dimension_semantics = [#tpu.dimension_semantics<parallel>], iteration_bounds = array<i64: 1>, scalar_prefetch = 0 : i64, scratch_operands = 0 : i64, tpu.core_type = #tpu.core_type<tc>, window_params = [{pipeline_mode = #tpu.pipeline_mode<synchronous>, transform_indices = @transform_0, window_bounds = array<i64: 16, 32>}, {pipeline_mode = #tpu.pipeline_mode<synchronous>, transform_indices = @transform_1, window_bounds = array<i64: 8, 32>}, {pipeline_mode = #tpu.pipeline_mode<synchronous>, transform_indices = @transform_2, window_bounds = array<i64: 8, 1>}, {transform_indices = @transform_3, window_bounds = array<i64: 2, 128>}, {transform_indices = @transform_4, window_bounds = array<i64: 1, 128>}]} {
    %c0 = arith.constant 0 : index
    %c0_0 = arith.constant 0 : index
    %0 = vector.load %arg2[%c0, %c0_0] : memref<8x32xf32, #tpu.memory_space<vmem>>, vector<8x32xf32>
    %c0_1 = arith.constant 0 : index
    %c0_2 = arith.constant 0 : index
    %1 = vector.load %arg1[%c0_1, %c0_2] : memref<16x32xf32, #tpu.memory_space<vmem>>, vector<16x32xf32>
    %cst = arith.constant dense<0.000000e+00> : vector<8x16xf32>
    %2 = tpu.matmul %0, %1, %cst {dimension_numbers = #tpu.dot_dimension_numbers<[1], [1], [0], [0], [0, 0, 1, 0], [], []>} : vector<8x32xf32>, vector<16x32xf32>, vector<8x16xf32> -> vector<8x16xf32>
    %c0_3 = arith.constant 0 : index
    %c0_4 = arith.constant 0 : index
    %3 = vector.load %arg3[%c0_3, %c0_4] : memref<8x1xf32, #tpu.memory_space<vmem>>, vector<8x1xf32>
    %4 = vector.broadcast %3 : vector<8x1xf32> to vector<8x16xf32>
    %5 = arith.addf %2, %4 : vector<8x16xf32>
    %c0_5 = arith.constant 0 : index
    %c0_6 = arith.constant 0 : index
    %6 = vector.load %arg4[%c0_5, %c0_6] : memref<2x128xi32, #tpu.memory_space<vmem>>, vector<1x128xi32>
    %c1 = arith.constant 1 : index
    %c0_7 = arith.constant 0 : index
    %7 = vector.load %arg4[%c1, %c0_7] : memref<2x128xi32, #tpu.memory_space<vmem>>, vector<1x128xi32>
    %8 = tpu.concatenate %6, %7 in 1 : vector<1x128xi32>, vector<1x128xi32> -> vector<1x256xi32>
    %9 = tpu.iota {dimensions = array<i32: 0>} : vector<16x1xi32>
    %10 = vector.broadcast %9 : vector<16x1xi32> to vector<16x256xi32>
    %11 = vector.broadcast %8 : vector<1x256xi32> to vector<16x256xi32>
    %12 = arith.cmpi eq, %10, %11 : vector<16x256xi32>
    %13 = arith.extui %12 : vector<16x256xi1> to vector<16x256xi32>
    %14 = arith.sitofp %13 : vector<16x256xi32> to vector<16x256xf32>
    %cst_8 = arith.constant dense<0.000000e+00> : vector<8x256xf32>
    %15 = tpu.matmul %5, %14, %cst_8 {dimension_numbers = #tpu.dot_dimension_numbers<[1], [0], [0], [1], [0, 0, 1, 1], [], []>} : vector<8x16xf32>, vector<16x256xf32>, vector<8x256xf32> -> vector<8x256xf32>
    %16 = vector.extract_strided_slice %15 {offsets = [0, 0], sizes = [8, 128], strides = [1, 1]} : vector<8x256xf32> to vector<8x128xf32>
    %17 = vector.extract_strided_slice %15 {offsets = [0, 128], sizes = [8, 128], strides = [1, 1]} : vector<8x256xf32> to vector<8x128xf32>
    %18 = arith.mulf %16, %17 : vector<8x128xf32>
    %cst_9 = arith.constant dense<0.000000e+00> : vector<128xf32>
    %19 = vector.multi_reduction <add>, %18, %cst_9 [0] : vector<8x128xf32> to vector<128xf32>
    %20 = vector.shape_cast %19 : vector<128xf32> to vector<1x128xf32>
    %c0_10 = arith.constant 0 : index
    %c0_11 = arith.constant 0 : index
    %21 = vector.load %arg5[%c0_10, %c0_11] : memref<1x128xf32, #tpu.memory_space<vmem>>, vector<1x128xf32>
    tpu.vector_store %arg5[%c0_10, %c0_11], %20 {strides = array<i32>} : memref<1x128xf32, #tpu.memory_space<vmem>>, vector<1x128xf32>,
    return
  }
  func.func @transform_0(%arg0: i32) -> (i32, i32) {
    %c0_i32 = arith.constant 0 : i32
    %c0_i32_0 = arith.constant 0 : i32
    %c0_i32_1 = arith.constant 0 : i32
    return %c0_i32, %c0_i32_0 : i32, i32
  }
  func.func @transform_1(%arg0: i32) -> (i32, i32) {
    %c0_i32 = arith.constant 0 : i32
    %c0_i32_0 = arith.constant 0 : i32
    %c0_i32_1 = arith.constant 0 : i32
    return %c0_i32, %c0_i32_0 : i32, i32
  }
  func.func @transform_2(%arg0: i32) -> (i32, i32) {
    %c0_i32 = arith.constant 0 : i32
    %c0_i32_0 = arith.constant 0 : i32
    %c0_i32_1 = arith.constant 0 : i32
    return %c0_i32, %c0_i32_0 : i32, i32
  }
  func.func @transform_3(%arg0: i32) -> (i32, i32) {
    %c0_i32 = arith.constant 0 : i32
    %c0_i32_0 = arith.constant 0 : i32
    return %c0_i32, %arg0 : i32, i32
  }
  func.func @transform_4(%arg0: i32) -> (i32, i32) {
    %c0_i32 = arith.constant 0 : i32
    %c0_i32_0 = arith.constant 0 : i32
    return %c0_i32, %arg0 : i32, i32
  }
}

</mosaic_0001>

<bundles_post_ra>
// kernel: logreg_forward.1
= control target key start
LH: loop header
LB: loop body
LE: loop exit
PB: predicated region body
PF: predicated region fallthrough
CT: control target
= control target key end

     0   :  { %9 = vsyncpa [#allocation3], 0  ;;  %s283_s15 = smov [#allocation2]   ;;  %s337_s0 = inlined_call_operand.vmem [shape: f32[16,32], index: 0, kind: input, shape index: {}]   ;;  %s338_s1 = inlined_call_operand.hbm [shape: f32[8,32], index: 1, kind: input, shape index: {}]   ;;  %s339_s2 = inlined_call_operand.vmem [shape: f32[8,1], index: 2, kind: input, shape index: {}]   ;;  %s340_s3 = inlined_call_operand.vmem [shape: s32[2,128], index: 3, kind: input, shape index: {}]   ;;  %s341_s4 = inlined_call_operand.vmem [shape: f32[1,128], index: 4, kind: output, shape index: {}]  }
   0x1   :  { %s18_s16 = sshll.u32 %s283_s15, 4  ;;  %s19_s16 = int_to_ptr.vmem [resolvable:$true] %s18_s16 }
   0x2   :  { %s269_s17 = scalar_lea.vmem %s19_s16, 128  ;;  %p274_p1 = scmp.lt.s32.totalorder %s19_s16, %s19_s16 }
   0x3   :  { %p270_p0 = scmp.ne.s32.totalorder %s19_s16, %s269_s17  ;;  %p275_p2 = scmp.lt.s32.totalorder %s269_s17, %s269_s17 }
   0x5   :  { %p276_p3 = por %p275_p2, %p274_p1 }
   0x7   :  { %p277_p4 = pnand %p276_p3, %p270_p0 }
   0x9   :  { %280 = shalt.err (!%p277_p4)
}
   0xa   :  { %21 = dma.hbm_to_vmem [thread:$0]  %s338_s1, 128, %s19_s16, [#allocation3]  }
   0xb   :  { %281 = dma.done.wait [#allocation3], 128  }
   0xc   :  { %282 = vsyncadd [#allocation3], 4294967168  ;;  %v284_v0 = vmov 0.0   ;;  %vm285_vm0 = vmmov 0   ;;  %v120_v1 = vlaneseq  ;;  %v286_v2 = vmov 0   ;;  %v31_v5 = vld [vmem:[%s337_s0 + $0x8] sm:$0xff] }
   0xd   :  { %248 = vmatprep.subr.mxu0 %v284_v0  ;;  %252 = vmatprep.mubr.msk.f32.mxu0 %vm285_vm0, %v284_v0  ;;  %vm38_vm1 = vcmask 261120   ;;  %v32_v6 = vld [vmem:[%s339_s2] sm:$0xff]  ;;  %v287_v10 = vmov 1.0   ;;  %vm143_vm6 = vcmask 130048  }
   0xe   :  { %260 = vset.pattern.permute.xlu0 %v286_v2  ;;  %211 = vmatprep.mubr.f32.mxu1 %v284_v0  ;;  %v121_v3 = vshrl.u32 %v120_v1, 7  ;;  %v235_v7 = vld [vmem:[%s340_s3 + $0x1] ss:$0 sm:$0xff]  ;;  %v234_v8 = vld [vmem:[%s340_s3] ss:$0 sm:$0xff] }
   0xf   :  { %249 = vmatpush3.xpose.msk.msra.mxu0 %vm38_vm1, %v31_v5  ;;  %v30_v9 = vld [vmem:[%s337_s0] sm:$0xff]  ;;  %35 = vperm.xlu0 %260, %v32_v6  }
  0x10   :  { %v122_v4 = vadd.s32 8, %v121_v3  ;;  %250 = vmatprep.subr.mxu0 %v284_v0  ;;  %vm132_vm2 = vcmp.eq.s32.totalorder %v121_v3, %v235_v7  ;;  %v29_v11 = vld [vmem:[#allocation2] sm:$0xff]  ;;  %vm131_vm5 = vcmp.eq.s32.totalorder %v121_v3, %v234_v8 }
  0x12   :  { %vm134_vm3 = vcmp.eq.s32.totalorder %v122_v4, %v235_v7  ;;  %vm133_vm4 = vcmp.eq.s32.totalorder %v122_v4, %v234_v8 }
  0x13   :  { %240 = vmatprep.subr.msk.mxu1 %vm134_vm3, %v287_v10  ;;  %251 = vmatpush3.xpose.msk.msra.mxu0 %vm38_vm1, %v30_v9 }
  0x14   :  { %241 = vmatpush1.msk.msra.mxu1 %vm133_vm4, %v287_v10 }
  0x15   :  { %242 = vmatprep.subr.msk.mxu1 %vm132_vm2, %v287_v10 }
  0x16   :  { %253 = vmatmul.mubr.msk.f32.vlgmr.msra.gmra.mxu0 %vm38_vm1, %v29_v11  ;;  %243 = vmatpush1.msk.msra.mxu1 %vm131_vm5, %v287_v10 }
  0x8a   :  { %v36_v12 = vpop.permute.xlu0 %35 }
  0xd6   :  { %v114_v13 = vpop.f32.mrf.mxu0 }
  0xd7   :  { %v115_v14 = vadd.f32 %v114_v13, %v36_v12 }
  0xd8   :  { %v254_v15 = vpop.f32.mrf.mxu0 }
  0xd9   :  { %244 = vmatmul.mubr.msk.f32.vlgmr.msra.gmra.mxu1 %vm143_vm6, %v115_v14 }
 0x199   :  { %v213_v16 = vpop.f32.mrf.mxu1 }
 0x19b   :  { %v215_v17 = vpop.f32.mrf.mxu1 }
 0x19c   :  { %v218_v18 = vmul.f32 %v215_v17, %v213_v16 }
 0x19e   :  { %v219_v19 = vrot.slane %v218_v18, 4 }
 0x1a0   :  { %v220_v20 = vadd.f32 %v219_v19, %v218_v18 }
 0x1a2   :  { %v221_v21 = vrot.slane %v220_v20, 2 }
 0x1a4   :  { %v222_v22 = vadd.f32 %v221_v21, %v220_v20 }
 0x1a6   :  { %v223_v23 = vrot.slane %v222_v22, 1 }
 0x1a8   :  { %v224_v24 = vadd.f32 %v223_v23, %v222_v22 }
 0x1aa   :  { %225 = vst [vmem:[%s341_s4] sm:$0x1] %v224_v24 }
 0x1ab   :  { %230 = vsyncpa [#allocation3], 1 }

</bundles_post_ra>
